<compile_context>
chip_gen: v7x
topology: tpu7x:2x2x1
jax: 0.10.0
libtpu: 0.0.40
codegen_flags: <defaults>
</compile_context>

<pallas_src>
import functools

import jax
import jax.numpy as jnp
from jax.experimental import pallas as pl
from jax.experimental.pallas import tpu as pltpu


# ------------------------------- kernels ------------------------------------


def _resident_kernel(log_alpha_ref, beta_ref, z_ref, z0_ref, out_ref):
    """Single pass: whole lane-dense z resident in VMEM (z read from HBM once)."""
    z = z_ref[...]                       # (rows, lanes)
    z0 = z0_ref[...]                     # (1, lanes)
    la = log_alpha_ref[0]                # SMEM scalars
    beta = beta_ref[0]

    # nn.Softplus(beta=1, threshold=20): linear above the threshold.
    alpha = jnp.where(la > 20.0, la, jnp.log1p(jnp.exp(la)))

    d = (z - z0).astype(jnp.float32)
    r = jnp.sqrt(jnp.sum(d * d))         # global norm over ALL elements (see header)
    denom = alpha + r
    s = beta * alpha / (denom * denom)   # == h1 + h2 (folded)
    out_ref[...] = (z + s).astype(out_ref.dtype)


def _sumsq_kernel(z_ref, z0_ref, ssq_ref):
    """Tiled pass 1: accumulate sum((z - z0)**2) into a resident (1, 1) output."""
    @pl.when(pl.program_id(0) == 0)
    def _():
        ssq_ref[...] = jnp.zeros_like(ssq_ref)

    d = z_ref[...].astype(jnp.float32) - z0_ref[...].astype(jnp.float32)
    ssq_ref[...] += jnp.sum(d * d)


def _scalar_add_kernel(s_ref, z_ref, out_ref):
    """Tiled pass 2: out = z + s  (s is a (1,1) value broadcast over the tile)."""
    out_ref[...] = (z_ref[...] + s_ref[...]).astype(out_ref.dtype)


# ------------------------------- wrapper -------------------------------------


def _softplus(x):
    return jnp.where(x > 20.0, x, jnp.log1p(jnp.exp(x)))


def _vmem_budget_bytes():
    cap = 64 * 1024 * 1024
    try:
        got = getattr(pltpu.get_tpu_info(), "vmem_capacity_bytes", None)
        if got:
            cap = int(got)
    except Exception:
        pass
    cap = max(cap, 32 * 1024 * 1024)
    return (3 * cap) // 4          # leave headroom below physical VMEM


@functools.partial(jax.jit, static_argnames=("force_tiled", "block_rows"))
def radial_transform(z, z_0, log_alpha, beta, force_tiled=False, block_rows=256):
    B, D = z.shape
    dtype = z.dtype
    log_alpha = jnp.asarray(log_alpha, jnp.float32).reshape(1)
    beta = jnp.asarray(beta, jnp.float32).reshape(1)
    z_0 = jnp.asarray(z_0, dtype).reshape(D)

    # ---- lane-dense repack: (B, D) -> (rows, lanes) ----
    if 128 % D == 0:
        reps, lanes = 128 // D, 128
    else:
        # TODO(synk): lane-dense repack needs 128 % D == 0; fall back to (B, D) rows.
        reps, lanes = 1, D

    z0_row = jnp.tile(z_0, reps).reshape(1, lanes)

    b_pad = (-B) % reps
    if b_pad:
        # Pad with copies of z_0: diff == 0 there, so the global norm is unchanged.
        z = jnp.concatenate(
            [z, jnp.broadcast_to(z_0[None, :], (b_pad, D)).astype(dtype)], axis=0)
    rows = (B + b_pad) // reps
    z_dense = z.reshape(rows, lanes)

    elt = jnp.dtype(dtype).itemsize
    resident_bytes = (2 * rows + 1) * lanes * elt
    budget = _vmem_budget_bytes()

    if (not force_tiled) and resident_bytes <= budget:
        # -------- single pass, whole array resident in VMEM --------
        out_dense = pl.pallas_call(
            _resident_kernel,
            out_shape=jax.ShapeDtypeStruct((rows, lanes), dtype),
            in_specs=[
                pl.BlockSpec(memory_space=pltpu.MemorySpace.SMEM),   # log_alpha (1,)
                pl.BlockSpec(memory_space=pltpu.MemorySpace.SMEM),   # beta      (1,)
                pl.BlockSpec(memory_space=pltpu.MemorySpace.VMEM),   # z_dense
                pl.BlockSpec(memory_space=pltpu.MemorySpace.VMEM),   # z0_row
            ],
            out_specs=pl.BlockSpec(memory_space=pltpu.MemorySpace.VMEM),
            input_output_aliases={2: 0},          # write result in place over z_dense
            compiler_params=pltpu.CompilerParams(
                vmem_limit_bytes=int(
                    min(budget, max(2 * resident_bytes, 16 * 1024 * 1024)))),
        )(log_alpha, beta, z_dense, z0_row)
    else:
        # -------- two-pass tiled: reduce, then fully-parallel broadcast-add --------
        br = min(int(block_rows), ((rows + 7) // 8) * 8)
        br = max(8, (br // 8) * 8)
        r_pad = (-rows) % br
        if r_pad:
            z_dense = jnp.concatenate(
                [z_dense, jnp.broadcast_to(z0_row, (r_pad, lanes)).astype(dtype)],
                axis=0)
        rows_t = rows + r_pad
        grid = (rows_t // br,)
        tile = pl.BlockSpec((br, lanes), lambda t: (t, 0))

        ssq = pl.pallas_call(
            _sumsq_kernel,
            out_shape=jax.ShapeDtypeStruct((1, 1), jnp.float32),
            grid=grid,
            in_specs=[tile, pl.BlockSpec((1, lanes), lambda t: (0, 0))],
            out_specs=pl.BlockSpec((1, 1), lambda t: (0, 0)),
            compiler_params=pltpu.CompilerParams(
                dimension_semantics=("arbitrary",)),
        )(z_dense, z0_row)[0, 0]

        alpha = _softplus(log_alpha[0])
        r = jnp.sqrt(ssq)
        denom = alpha + r
        s = (beta[0] * alpha / (denom * denom)).reshape(1, 1)   # == h1 + h2

        out_t = pl.pallas_call(
            _scalar_add_kernel,
            out_shape=jax.ShapeDtypeStruct((rows_t, lanes), dtype),
            grid=grid,
            in_specs=[pl.BlockSpec((1, 1), lambda t: (0, 0)), tile],
            out_specs=tile,
            input_output_aliases={1: 0},          # write result in place over z tiles
            compiler_params=pltpu.CompilerParams(
                dimension_semantics=("parallel",)),
        )(s, z_dense)
        out_dense = out_t[:rows]

    return out_dense.reshape(rows * reps, D)[:B]


# --------------------------------- test --------------------------------------

if __name__ == "__main__":
    key = jax.random.PRNGKey(0)
    k1, k2, k3, k4, k5 = jax.random.split(key, 5)

    dim = 32
    # parameter_init(low, high, size): (low - high) * U[0,1) + high
    z_0 = (-0.1 - 0.1) * jax.random.uniform(k1, (dim,), jnp.float32) + 0.1
    log_alpha = (-4.0 - 5.0) * jax.random.uniform(k2, (1,), jnp.float32) + 5.0
    beta = (-0.1 - 0.1) * jax.random.uniform(k3, (1,), jnp.float32) + 0.1

    def reference(z):
        alpha = jnp.log1p(jnp.exp(log_alpha[0]))
        diff = z - z_0[None, :]
        r = jnp.sqrt(jnp.sum(diff * diff))        # legacy torch.norm(dim=[]) = global norm
        h1 = beta[0] / (alpha + r)
        h2 = -beta[0] * r / (alpha + r) ** 2
        return z + h1 + h2

    # --- small input: lane-dense, whole-array-resident single pass ---
    z_small = jax.random.normal(k4, (8, dim), jnp.float32)
    out_small = jax.block_until_ready(radial_transform(z_small, z_0, log_alpha, beta))
    assert out_small.shape == z_small.shape and out_small.dtype == z_small.dtype
    assert jnp.allclose(out_small, reference(z_small), atol=1e-5, rtol=1e-5)

    # --- larger / ragged input: forced two-pass tiled path (reduce + parallel add) ---
    z_big = jax.random.normal(k5, (1001, dim), jnp.float32)
    out_big = jax.block_until_ready(
        radial_transform(z_big, z_0, log_alpha, beta, force_tiled=True, block_rows=64))
    assert out_big.shape == z_big.shape and out_big.dtype == z_big.dtype
    assert jnp.allclose(out_big, reference(z_big), atol=1e-5, rtol=1e-5)

    print("KERNEL_OK")
</pallas_src>

<mosaic_0001>
module attributes {stable_mosaic.version = 11 : i64} {
  func.func @_resident_kernel(%arg0: memref<1xf32, #tpu.memory_space<smem>>, %arg1: memref<1xf32, #tpu.memory_space<smem>>, %arg2: memref<2x128xf32, #tpu.memory_space<vmem>>, %arg3: memref<1x128xf32, #tpu.memory_space<vmem>>, %arg4: memref<2x128xf32, #tpu.memory_space<vmem>>) attributes {dimension_semantics = [], scalar_prefetch = 0 : i64, scratch_operands = 0 : i64, tpu.core_type = #tpu.core_type<tc>} {
    %c0 = arith.constant 0 : index
    %c0_0 = arith.constant 0 : index
    %0 = vector.load %arg2[%c0, %c0_0] : memref<2x128xf32, #tpu.memory_space<vmem>>, vector<2x128xf32>
    %c0_1 = arith.constant 0 : index
    %c0_2 = arith.constant 0 : index
    %1 = vector.load %arg3[%c0_1, %c0_2] : memref<1x128xf32, #tpu.memory_space<vmem>>, vector<1x128xf32>
    %c0_3 = arith.constant 0 : index
    %2 = memref.load %arg0[%c0_3] : memref<1xf32, #tpu.memory_space<smem>>
    %c0_4 = arith.constant 0 : index
    %3 = memref.load %arg1[%c0_4] : memref<1xf32, #tpu.memory_space<smem>>
    %cst = arith.constant 2.000000e+01 : f32
    %4 = arith.cmpf ogt, %2, %cst : f32
    %5 = math.exp %2 : f32
    %6 = math.log1p %5 : f32
    %7 = arith.select %4, %2, %6 : f32
    %8 = vector.broadcast %1 : vector<1x128xf32> to vector<2x128xf32>
    %9 = arith.subf %0, %8 : vector<2x128xf32>
    %10 = arith.mulf %9, %9 : vector<2x128xf32>
    %11 = vector.shape_cast %10 : vector<2x128xf32> to vector<1x2x128xf32>
    %cst_5 = arith.constant dense<0.000000e+00> : vector<1xf32>
    %12 = vector.multi_reduction <add>, %11, %cst_5 [1, 2] : vector<1x2x128xf32> to vector<1xf32>
    %13 = vector.shape_cast %12 : vector<1xf32> to vector<1x1x1xf32>
    %14 = vector.extract %13[0, 0, 0] : f32 from vector<1x1x1xf32>
    %15 = math.sqrt %14 : f32
    %16 = arith.addf %7, %15 : f32
    %17 = arith.mulf %3, %7 : f32
    %18 = arith.mulf %16, %16 : f32
    %19 = arith.divf %17, %18 : f32
    %20 = vector.broadcast %19 : f32 to vector<2x128xf32>
    %21 = arith.addf %0, %20 : vector<2x128xf32>
    %c0_6 = arith.constant 0 : index
    %c0_7 = arith.constant 0 : index
    %22 = vector.load %arg4[%c0_6, %c0_7] : memref<2x128xf32, #tpu.memory_space<vmem>>, vector<2x128xf32>
    tpu.vector_store %arg4[%c0_6, %c0_7], %21 {strides = array<i32>} : memref<2x128xf32, #tpu.memory_space<vmem>>, vector<2x128xf32>,
    return
  }
}

</mosaic_0001>

<bundles_post_ra>
// kernel: tile.8
= control target key start
LH: loop header
LB: loop body
LE: loop exit
PB: predicated region body
PF: predicated region fallthrough
CT: control target
= control target key end

     0   :  { %s22_s0 = inlined_call_operand.vmem [shape: f32[32], index: 0, kind: input, shape index: {}]   ;;  %s23_s1 = inlined_call_operand.vmem [shape: f32[4,32], index: 1, kind: output, shape index: {}]  }
   0x1   :  { %v4_v0 = vld [vmem:[%s22_s0] ss:$0 sm:$0xff] }
   0x2   :  { %5 = vst [vmem:[%s23_s1] sm:$0xf] %v4_v0 }

// kernel: tile.9
= control target key start
LH: loop header
LB: loop body
LE: loop exit
PB: predicated region body
PF: predicated region fallthrough
CT: control target
= control target key end

     0   :  { %vm7_vm0 = vcmask 261120   ;;  %s37_s8 = smov 32   ;;  %s38_s9 = smov 64   ;;  %vm13_vm1 = vcmask 1048320   ;;  %vm19_vm2 = vcmask 785920   ;;  %vm25_vm3 = vcmask 523520   ;;  %s55_s0 = inlined_call_operand.vmem [shape: f32[4,32], index: 0, kind: input, shape index: {}]   ;;  %s56_s1 = inlined_call_operand.vmem [shape: f32[1,128], index: 1, kind: output, shape index: {}]  }
   0x1   :  { %v4_v0 = vld [vmem:[%s55_s0] sm:$0xf]  ;;  %s36_s0 = smov 96  }
   0x2   :  { %5 = vst [vmem:[#allocation1] sm:$0xf] %v4_v0 }
   0x9   :  { %v10_v1 = vld [vmem:[#allocation1 + $0x3] sm:$0x1]   ;;  %v22_v2 = vld [vmem:[#allocation1 + $0x1] sm:$0x1]   ;;  %v6_v3 = vld [vmem:[#allocation1] sm:$0x1]  }
   0xa   :  { %11 = vrot.lane.b32.xlu0 %v10_v1, %s36_s0  ;;  %23 = vrot.lane.b32.xlu1 %v22_v2, %s37_s8  ;;  %v16_v4 = vld [vmem:[#allocation1 + $0x2] sm:$0x1]   ;;  %8 = vst.msk [vmem:[#allocation0] sm:$0x1] %vm7_vm0, %v6_v3  }
   0xe   :  { %17 = vrot.lane.b32.xlu0 %v16_v4, %s38_s9 }
  0x7c   :  { %v12_v5 = vpop.permute.xlu0 %11   ;;  %v24_v6 = vpop.permute.xlu1 %23  }
  0x7d   :  { %14 = vst.msk [vmem:[#allocation0] sm:$0x1] %vm13_vm1, %v12_v5  }
  0x80   :  { %v18_v7 = vpop.permute.xlu0 %17  }
  0x81   :  { %20 = vst.msk [vmem:[#allocation0] sm:$0x1] %vm19_vm2, %v18_v7  }
  0x82   :  { %26 = vst.msk [vmem:[#allocation0] sm:$0x1] %vm25_vm3, %v24_v6  }
  0x89   :  { %v30_v8 = vld [vmem:[#allocation0] sm:$0x1] }
  0x8a   :  { %32 = vst [vmem:[%s56_s1] sm:$0x1] %v30_v8 }

// kernel: radial_transform.1
= control target key start
LH: loop header
LB: loop body
LE: loop exit
PB: predicated region body
PF: predicated region fallthrough
CT: control target
= control target key end

     0   :  { %vm48_vm0 = vcmask 1041408   ;;  %s147_s2 = inlined_call_operand.vmem [shape: f32[2,128], index: 2, kind: input, shape index: {}, may-alias: {2,4}]   ;;  %s148_s3 = inlined_call_operand.vmem [shape: f32[1,128], index: 3, kind: input, shape index: {}]   ;;  %s149_s0 = inlined_call_operand.<no memory space> [shape: f32[1], index: 0, kind: input, shape index: {}]   ;;  %s150_s1 = inlined_call_operand.<no memory space> [shape: f32[1], index: 1, kind: input, shape index: {}]   ;;  %s151_s4 = inlined_call_operand.vmem [shape: f32[2,128], index: 4, kind: output, shape index: {}, may-alias: {2,4}]  }
   0x1   :  { %v19_v0 = vld [vmem:[%s147_s2] sm:$0x3]  ;;  %v24_v2 = vstv %s149_s0  ;;  %p23_p0 = scmp.gt.f32.partialorder %s149_s0, 20.0 }
   0x2   :  { %v82_v1 = vld [vmem:[%s148_s3] ss:$0 sm:$0xff]  ;;  %v25_v4 = vmul.f32 1.442695, %v24_v2 }
   0x3   :  { %v46_v3 = vsub.f32 %v19_v0, %v82_v1 }
   0x4   :  { %93 = vpow2.f32 %v25_v4 }
   0x5   :  { %v47_v5 = vmul.f32 %v46_v3, %v46_v3 }
   0x7   :  { %v49_v6 = vsel %vm48_vm0, %v47_v5, 0.0 }
   0x8   :  { %50 = vadd.xlane.f32.xlu0 %v49_v6 }
   0xe   :  { %v94_v7 = vpop.eup %93 }
   0xf   :  { %83 = vpush %v94_v7 }
  0x40   :  { %s84_s21 = spop %83 }
  0x41   :  { %v28_v8 = vstv %s84_s21 }
  0x42   :  { %v29_v9 = vadd.f32 1.0, %v28_v8  ;;  %v32_v10 = vmul.f32 -0.5, %v28_v8  ;;  %v35_v12 = vand.u32 2147483647, %v28_v8 }
  0x44   :  { %95 = vlog2.f32 %v29_v9  ;;  %v33_v11 = vadd.f32 1.0, %v32_v10  ;;  %vm36_vm1 = vcmp.lt.f32.partialorder %v35_v12, 0.0004427343 }
  0x46   :  { %v34_v13 = vmul.f32 %v33_v11, %v28_v8 }
  0x4e   :  { %v96_v14 = vpop.eup %95 }
  0x4f   :  { %v31_v15 = vmul.f32 0.6931472, %v96_v14 }
  0x51   :  { %v37_v16 = vsel %vm36_vm1, %v34_v13, %v31_v15 }
  0x52   :  { %85 = vpush %v37_v16 }
  0x83   :  { %s86_s2 = spop %85 }
  0x84   :  { %s153_s0 = smov (!%p23_p0, %s149_s0), %s86_s2 }
  0x85   :  { %s69_s5 = smul.f32 %s153_s0, %s150_s1 }
  0x95   :  { %v51_v17 = vpop.xlane.xlu0 %50 }
  0x96   :  { %v52_v18 = vrot.slane %v51_v17, 4 }
  0x98   :  { %v53_v19 = vadd.f32 %v52_v18, %v51_v17 }
  0x9a   :  { %v54_v20 = vrot.slane %v53_v19, 2 }
  0x9c   :  { %v55_v21 = vadd.f32 %v54_v20, %v53_v19 }
  0x9e   :  { %v56_v22 = vrot.slane %v55_v21, 1 }
  0xa0   :  { %v57_v23 = vadd.f32 %v56_v22, %v55_v21 }
  0xa2   :  { %87 = vpush %v57_v23 }
  0xd3   :  { %s88_s3 = spop %87 }
  0xd4   :  { %v59_v24 = vstv %s88_s3 }
  0xd5   :  { %97 = vrsqrt.f32 %v59_v24  ;;  %vm62_vm2 = vcmp.eq.f32.partialorder %v59_v24, inf  ;;  %v65_v27 = vand.u32 2147483648, %v59_v24  ;;  %vm64_vm3 = vcmp.eq.f32.partialorder %v59_v24, 0.0 }
  0xdf   :  { %v98_v25 = vpop.eup %97 }
  0xe0   :  { %v61_v26 = vmul.f32 %v98_v25, %v59_v24 }
  0xe2   :  { %v63_v28 = vsel %vm62_vm2, %v59_v24, %v61_v26 }
  0xe3   :  { %v66_v29 = vsel %vm64_vm3, %v65_v27, %v63_v28 }
  0xe4   :  { %89 = vpush %v66_v29 }
 0x115   :  { %s90_s26 = spop %89 }
 0x116   :  { %s68_s27 = sadd.f32 %s90_s26, %s153_s0 }
 0x118   :  { %s70_s28 = smul.f32 %s68_s27, %s68_s27 }
 0x11a   :  { %v71_v30 = vstv %s70_s28 }
 0x11b   :  { %99 = vrcp.f32 %v71_v30 }
 0x125   :  { %v100_v31 = vpop.eup %99 }
 0x126   :  { %91 = vpush %v100_v31 }
 0x157   :  { %s92_s6 = spop %91 }
 0x158   :  { %s74_s7 = smul.f32 %s92_s6, %s69_s5 }
 0x15a   :  { %v75_v32 = vstv %s74_s7 }
 0x15b   :  { %v76_v33 = vadd.f32 %v75_v32, %v19_v0 }
 0x15d   :  { %77 = vst [vmem:[%s151_s4] sm:$0x3] %v76_v33 }

</bundles_post_ra>
